<compile_context>
chip_gen: v7x
topology: tpu7x:2x2x1
jax: 0.10.0
libtpu: 0.0.40
codegen_flags: <defaults>
</compile_context>

<pallas_src>
import functools
import math

import jax
import jax.numpy as jnp
from jax import lax
from jax.experimental import pallas as pl
from jax.experimental.pallas import tpu as pltpu


# ---------------------------------------------------------------------------
# Path A: small-vocab fast path (table resident in VMEM, one-hot MXU gather).
# ---------------------------------------------------------------------------
def _embedding_vmem_kernel(ids_ref, table_ref, out_ref, *, scale):
    tile = out_ref.shape[0]
    vocab = table_ref.shape[0]
    ids = ids_ref[...]                                           # (tile, 1) i32
    cols = lax.broadcasted_iota(jnp.int32, (tile, vocab), 1)
    onehot = (cols == ids).astype(table_ref.dtype)               # (tile, vocab)
    rows = jnp.dot(onehot, table_ref[...],
                   preferred_element_type=jnp.float32)           # (tile, d)
    out_ref[...] = (rows * scale).astype(out_ref.dtype)


# ---------------------------------------------------------------------------
# Path B: large-vocab path (HBM table, double-buffered per-row DMA gather).
# ---------------------------------------------------------------------------
def _embedding_gather_kernel(ids_ref, table_ref, out_ref, buf, sem, *,
                             token_tile, scale):
    i = pl.program_id(0)
    nsteps = pl.num_programs(0)

    def issue(step, slot):
        base = step * token_tile

        def body(t, carry):
            row = ids_ref[base + t]                  # SMEM scalar (pre-clamped)
            pltpu.make_async_copy(
                table_ref.at[pl.ds(row, 1), :],      # (1, d) row in HBM
                buf.at[slot, pl.ds(t, 1), :],        # (1, d) row in VMEM
                sem.at[slot],
            ).start()
            return carry

        lax.fori_loop(0, token_tile, body, 0, unroll=8)

    # Prime this grid's first tile (grid axis is "arbitrary" => sequential,
    # so step 0 really is the first step executed).
    @pl.when(i == 0)
    def _prime():
        issue(0, 0)

    # Prefetch the NEXT tile's rows before draining/consuming the current
    # slot -- overlaps step i+1's gather with step i's drain + store.
    @pl.when(i + 1 < nsteps)
    def _prefetch_next():
        issue(i + 1, (i + 1) % 2)

    # Drain current slot: per-row waits with descriptors identical in shape to
    # the issued copies (correct for both byte- and count-based accounting).
    slot = i % 2

    def drain(t, carry):
        pltpu.make_async_copy(
            table_ref.at[pl.ds(0, 1), :],
            buf.at[slot, pl.ds(0, 1), :],
            sem.at[slot],
        ).wait()
        return carry

    lax.fori_loop(0, token_tile, drain, 0, unroll=8)

    # Fused scale + lane-dense store of the whole tile.
    out_ref[...] = (buf[slot] * scale).astype(out_ref.dtype)


def token_embeddings(x, table, *, token_tile=256,
                     vmem_table_bytes_limit=4 * 1024 * 1024,
                     vmem_vocab_limit=4096,
                     force_hbm_gather=False):
    """Pallas equivalent of TokenEmbeddings.forward: table[x] * sqrt(d_model).

    Args:
      x:     integer token ids of any shape, values in [0, vocab_size).
      table: embedding table of shape (vocab_size, d_model).
    Returns:
      x.shape + (d_model,) array equal to table[x] * sqrt(d_model).
    """
    orig_shape = x.shape
    vocab_size, d_model = table.shape
    n = math.prod(orig_shape)
    scale = float(math.sqrt(d_model))
    itemsize = table.dtype.itemsize

    # Lane-dense output slab: pad embedding dim to a multiple of 128.
    d_pad = ((d_model + 127) // 128) * 128
    table_k = table if d_pad == d_model else jnp.pad(
        table, ((0, 0), (0, d_pad - d_model)))

    # Tile: as big as possible (amortizes ~0.35 us/grid-step), multiple of 8,
    # capped so double-buffered gather + pipelined output fit v7x VMEM.
    tile = min(int(token_tile), pl.next_power_of_2(max(n, 8)))
    vmem_cap_tile = (24 * 1024 * 1024) // max(1, 6 * d_pad * itemsize)
    tile = min(tile, max(8, vmem_cap_tile))
    tile = max(8, (tile // 8) * 8)
    n_pad = pl.cdiv(n, tile) * tile
    grid = (n_pad // tile,)

    # Clamp ids (cheap, avoids OOB HBM DMAs) and pad to the tile boundary.
    ids = jnp.clip(x.reshape(-1).astype(jnp.int32), 0, vocab_size - 1)
    if n_pad != n:
        ids = jnp.pad(ids, (0, n_pad - n))       # row 0 is always valid

    table_bytes = vocab_size * d_pad * itemsize
    use_vmem_path = ((not force_hbm_gather)
                     and table_bytes <= vmem_table_bytes_limit
                     and vocab_size <= vmem_vocab_limit)

    if use_vmem_path:
        kernel = functools.partial(_embedding_vmem_kernel, scale=scale)
        out_flat = pl.pallas_call(
            kernel,
            out_shape=jax.ShapeDtypeStruct((n_pad, d_pad), table.dtype),
            grid_spec=pltpu.PrefetchScalarGridSpec(
                num_scalar_prefetch=0,
                grid=grid,
                in_specs=[
                    pl.BlockSpec((tile, 1), lambda i: (i, 0)),
                    # Whole table, constant block index -> fetched once.
                    pl.BlockSpec((vocab_size, d_pad), lambda i: (0, 0)),
                ],
                out_specs=pl.BlockSpec((tile, d_pad), lambda i: (i, 0)),
            ),
            compiler_params=pltpu.CompilerParams(
                dimension_semantics=("parallel",)),
        )(ids.reshape(n_pad, 1), table_k)
    else:
        kernel = functools.partial(_embedding_gather_kernel,
                                   token_tile=tile, scale=scale)
        out_flat = pl.pallas_call(
            kernel,
            out_shape=jax.ShapeDtypeStruct((n_pad, d_pad), table.dtype),
            grid_spec=pltpu.PrefetchScalarGridSpec(
                num_scalar_prefetch=1,            # ids -> SMEM
                grid=grid,
                in_specs=[
                    pl.BlockSpec(memory_space=pl.ANY),   # table stays in HBM
                ],
                out_specs=pl.BlockSpec((tile, d_pad),
                                       lambda i, ids_ref: (i, 0)),
                scratch_shapes=[
                    pltpu.VMEM((2, tile, d_pad), table.dtype),  # gather slots
                    pltpu.SemaphoreType.DMA((2,)),              # per-slot sems
                ],
            ),
            # "arbitrary": cross-step gather prefetch carries state between
            # grid steps, which requires sequential execution of the axis.
            compiler_params=pltpu.CompilerParams(
                dimension_semantics=("arbitrary",)),
        )(ids, table_k)

    if n_pad != n or d_pad != d_model:
        out_flat = out_flat[:n, :d_model]
    return out_flat.reshape(*orig_shape, d_model)


if __name__ == "__main__":
    d_model = 128
    vocab_size = 256
    batch, seq = 2, 8

    key = jax.random.PRNGKey(0)
    k_emb, k_ids, k_ids2, k_emb3, k_ids3 = jax.random.split(key, 5)

    # nn.Embedding default init: weights ~ N(0, 1).
    table = jax.random.normal(k_emb, (vocab_size, d_model), dtype=jnp.float32)
    x = jax.random.randint(k_ids, (batch, seq), 0, vocab_size, dtype=jnp.int32)

    # 1) Small-vocab fast path (table resident in VMEM).
    out = jax.block_until_ready(token_embeddings(x, table))
    ref = table[x] * math.sqrt(d_model)
    assert out.shape == (batch, seq, d_model)
    assert jnp.allclose(out, ref, atol=1e-5, rtol=1e-5)

    # 2) HBM-gather path (forced), token count not a multiple of the tile and
    #    multiple grid steps -> exercises id padding, output slicing, and the
    #    cross-step double-buffered gather prefetch.
    x2 = jax.random.randint(k_ids2, (3, 5), 0, vocab_size, dtype=jnp.int32)
    out2 = jax.block_until_ready(
        token_embeddings(x2, table, token_tile=8, force_hbm_gather=True))
    ref2 = table[x2] * math.sqrt(d_model)
    assert out2.shape == (3, 5, d_model)
    assert jnp.allclose(out2, ref2, atol=1e-5, rtol=1e-5)

    # 3) d_model not a multiple of 128 -> exercises lane padding of the output.
    d_model3, vocab3 = 96, 64
    table3 = jax.random.normal(k_emb3, (vocab3, d_model3), dtype=jnp.float32)
    x3 = jax.random.randint(k_ids3, (2, 8), 0, vocab3, dtype=jnp.int32)
    out3 = jax.block_until_ready(token_embeddings(x3, table3))
    ref3 = table3[x3] * math.sqrt(d_model3)
    assert out3.shape == (2, 8, d_model3)
    assert jnp.allclose(out3, ref3, atol=1e-4, rtol=1e-4)

    print("KERNEL_OK")
</pallas_src>

<mosaic_0001>
module attributes {stable_mosaic.version = 11 : i64} {
  func.func @_embedding_vmem_kernel(%arg0: i32, %arg1: memref<16x1xi32, #tpu.memory_space<vmem>>, %arg2: memref<256x128xf32, #tpu.memory_space<vmem>>, %arg3: memref<16x128xf32, #tpu.memory_space<vmem>>) attributes {dimension_semantics = [#tpu.dimension_semantics<parallel>], iteration_bounds = array<i64: 1>, scalar_prefetch = 0 : i64, scratch_operands = 0 : i64, tpu.core_type = #tpu.core_type<tc>, window_params = [{transform_indices = @transform_0, window_bounds = array<i64: 16, 1>}, {pipeline_mode = #tpu.pipeline_mode<synchronous>, transform_indices = @transform_1, window_bounds = array<i64: 256, 128>}, {transform_indices = @transform_2, window_bounds = array<i64: 16, 128>}]} {
    %c0 = arith.constant 0 : index
    %c0_0 = arith.constant 0 : index
    %0 = vector.load %arg1[%c0, %c0_0] : memref<16x1xi32, #tpu.memory_space<vmem>>, vector<16x1xi32>
    %1 = tpu.iota {dimensions = array<i32: 1>} : vector<16x256xi32>
    %2 = vector.broadcast %0 : vector<16x1xi32> to vector<16x256xi32>
    %3 = arith.cmpi eq, %1, %2 : vector<16x256xi32>
    %4 = arith.extui %3 : vector<16x256xi1> to vector<16x256xi32>
    %5 = arith.sitofp %4 : vector<16x256xi32> to vector<16x256xf32>
    %c0_1 = arith.constant 0 : index
    %c0_2 = arith.constant 0 : index
    %6 = vector.load %arg2[%c0_1, %c0_2] : memref<256x128xf32, #tpu.memory_space<vmem>>, vector<256x128xf32>
    %cst = arith.constant dense<0.000000e+00> : vector<16x128xf32>
    %7 = tpu.matmul %5, %6, %cst {dimension_numbers = #tpu.dot_dimension_numbers<[1], [0], [0], [1], [0, 0, 1, 1], [], []>} : vector<16x256xf32>, vector<256x128xf32>, vector<16x128xf32> -> vector<16x128xf32>
    %cst_3 = arith.constant 11.3137083 : f32
    %8 = vector.broadcast %cst_3 : f32 to vector<16x128xf32>
    %9 = arith.mulf %7, %8 : vector<16x128xf32>
    %c0_4 = arith.constant 0 : index
    %c0_5 = arith.constant 0 : index
    %10 = vector.load %arg3[%c0_4, %c0_5] : memref<16x128xf32, #tpu.memory_space<vmem>>, vector<16x128xf32>
    tpu.vector_store %arg3[%c0_4, %c0_5], %9 {strides = array<i32>} : memref<16x128xf32, #tpu.memory_space<vmem>>, vector<16x128xf32>,
    return
  }
  func.func @transform_0(%arg0: i32) -> (i32, i32) {
    %c0_i32 = arith.constant 0 : i32
    %c0_i32_0 = arith.constant 0 : i32
    return %arg0, %c0_i32 : i32, i32
  }
  func.func @transform_1(%arg0: i32) -> (i32, i32) {
    %c0_i32 = arith.constant 0 : i32
    %c0_i32_0 = arith.constant 0 : i32
    %c0_i32_1 = arith.constant 0 : i32
    return %c0_i32, %c0_i32_0 : i32, i32
  }
  func.func @transform_2(%arg0: i32) -> (i32, i32) {
    %c0_i32 = arith.constant 0 : i32
    %c0_i32_0 = arith.constant 0 : i32
    return %arg0, %c0_i32 : i32, i32
  }
}

</mosaic_0001>

<bundles_post_ra>
// kernel: tpu_custom_call.1
= control target key start
LH: loop header
LB: loop body
LE: loop exit
PB: predicated region body
PF: predicated region fallthrough
CT: control target
= control target key end

     0   :  { %7 = vsyncpa [#allocation3], 0  ;;  %s383_s0 = inlined_call_operand.vmem [shape: s32[16,1], index: 0, kind: input, shape index: {}]   ;;  %s384_s1 = inlined_call_operand.hbm [shape: f32[256,128], index: 1, kind: input, shape index: {}]   ;;  %s385_s2 = inlined_call_operand.hbm [shape: f32[16,128], index: 2, kind: output, shape index: {}]  }
   0x1   :  { %8 = vsyncpa [#allocation4], 0  ;;  %s326_s9 = smov [#allocation2]   ;;  %s278_s13 = scalar_lea.hbm %s384_s1, 4096 }
   0x2   :  { %s16_s10 = sshll.u32 %s326_s9, 4  ;;  %p279_p0 = scmp.ne.s32.totalorder %s384_s1, %s278_s13  ;;  %s17_s10 = int_to_ptr.vmem [resolvable:$true] %s16_s10 }
   0x3   :  { %p282_p1 = scmp.lt.u32.totalorder %s278_s13, %s384_s1 }
   0x5   :  { %p284_p2 = pnand %p282_p1, %p279_p0 }
   0x7   :  { %287 = shalt.err (!%p284_p2)
}
   0x8   :  { %s288_s18 = scalar_lea.vmem %s17_s10, 4096  ;;  %p293_p4 = scmp.lt.s32.totalorder %s17_s10, %s17_s10 }
   0x9   :  { %p289_p3 = scmp.ne.s32.totalorder %s17_s10, %s288_s18  ;;  %p294_p5 = scmp.lt.s32.totalorder %s288_s18, %s288_s18 }
   0xb   :  { %p295_p6 = por %p294_p5, %p293_p4 }
   0xd   :  { %p296_p7 = pnand %p295_p6, %p289_p3 }
   0xf   :  { %299 = shalt.err (!%p296_p7)
}
  0x10   :  { %s327_s19 = smov 128   ;;  %s328_s20 = smov 8  }
  0x11   :  { %22 = dma.hbm_to_vmem [thread:$0]  %s384_s1, 4096, %s17_s10, [#allocation3], %s327_s19, %s327_s19, %s328_s20  }
  0x12   :  { %322 = dma.done.wait [#allocation3], 4096  }
  0x13   :  { %323 = vsyncadd [#allocation3], 4294963200  ;;  %v329_v0 = vmov 0   ;;  %v26_v1 = vld [vmem:[%s383_s0] sm:$0xff]  ;;  %v27_v2 = vld [vmem:[%s383_s0 + $0x8] sm:$0xff]  ;;  %v28_v51 = vlaneseq  ;;  %v330_v55 = vmov 1.0  }
  0x14   :  { %277 = vset.pattern.permute.xlu0 %v329_v0  ;;  %v65_v3 = vld [vmem:[#allocation2 + $0x80] sm:$0xff]  ;;  %v66_v4 = vld [vmem:[#allocation2 + $0x88] sm:$0xff]  ;;  %v67_v9 = vld [vmem:[#allocation2 + $0x90] sm:$0xff]  ;;  %s331_s0 = smov [#allocation5]  }
  0x15   :  { %32 = vperm.xlu0 %277, %v26_v1   ;;  %v49_v5 = vld [vmem:[#allocation2] sm:$0xff]  ;;  %v50_v6 = vld [vmem:[#allocation2 + $0x8] sm:$0xff]  ;;  %v223_v7 = vpack.c.bf16 %v66_v4, %v65_v3  ;;  %v68_v10 = vld [vmem:[#allocation2 + $0x98] sm:$0xff]  ;;  %v29_v52 = vand.u32 127, %v28_v51  ;;  %s165_s1 = sshll.u32 %s331_s0, 4  ;;  %s166_s1 = int_to_ptr.vmem [resolvable:$true] %s165_s1 }
  0x16   :  { %v225_v8 = vpack.c.bf16 %v50_v6, %v49_v5  ;;  %v51_v11 = vld [vmem:[#allocation2 + $0x10] sm:$0xff]  ;;  %v227_v12 = vpack.c.bf16 %v68_v10, %v67_v9  ;;  %v52_v13 = vld [vmem:[#allocation2 + $0x18] sm:$0xff]  ;;  %v69_v14 = vld [vmem:[#allocation2 + $0xa0] sm:$0xff]  ;;  %s300_s27 = scalar_lea.vmem %s166_s1, 256  ;;  %p305_p9 = scmp.lt.s32.totalorder %s166_s1, %s166_s1 }
  0x17   :  { %v70_v15 = vld [vmem:[#allocation2 + $0xa8] sm:$0xff]  ;;  %224 = vmatprep.subr.bf16.mxu0 %v223_v7  ;;  %255 = vmatprep.subr.bf16.mxu1 %v223_v7  ;;  %v229_v16 = vpack.c.bf16 %v52_v13, %v51_v11  ;;  %v53_v18 = vld [vmem:[#allocation2 + $0x20] sm:$0xff]  ;;  %v71_v20 = vld [vmem:[#allocation2 + $0xb0] sm:$0xff]  ;;  %v30_v53 = vadd.s32 128, %v29_v52  ;;  %p301_p8 = scmp.ne.s32.totalorder %s166_s1, %s300_s27  ;;  %p306_p10 = scmp.lt.s32.totalorder %s300_s27, %s300_s27 }
  0x18   :  { %226 = vmatpush3.bf16.msra.mxu0 %v225_v8  ;;  %263 = vmatpush3.bf16.msra.mxu1 %v225_v8  ;;  %v231_v17 = vpack.c.bf16 %v70_v15, %v69_v14  ;;  %v54_v19 = vld [vmem:[#allocation2 + $0x28] sm:$0xff]  ;;  %v72_v21 = vld [vmem:[#allocation2 + $0xb8] sm:$0xff]  ;;  %v55_v24 = vld [vmem:[#allocation2 + $0x30] sm:$0xff] }
  0x19   :  { %35 = vperm.xlu0 %277, %v27_v2   ;;  %228 = vmatprep.subr.bf16.mxu0 %v227_v12  ;;  %v233_v22 = vpack.c.bf16 %v54_v19, %v53_v18  ;;  %v235_v23 = vpack.c.bf16 %v72_v21, %v71_v20  ;;  %v56_v25 = vld [vmem:[#allocation2 + $0x38] sm:$0xff]  ;;  %v73_v26 = vld [vmem:[#allocation2 + $0xc0] sm:$0xff]  ;;  %v74_v27 = vld [vmem:[#allocation2 + $0xc8] sm:$0xff]  ;;  %p307_p11 = por %p306_p10, %p305_p9 }
  0x1a   :  { %256 = vmatprep.subr.bf16.mxu1 %v227_v12  ;;  %v237_v28 = vpack.c.bf16 %v56_v25, %v55_v24  ;;  %v239_v29 = vpack.c.bf16 %v74_v27, %v73_v26  ;;  %v57_v30 = vld [vmem:[#allocation2 + $0x40] sm:$0xff]  ;;  %v58_v31 = vld [vmem:[#allocation2 + $0x48] sm:$0xff]  ;;  %v75_v32 = vld [vmem:[#allocation2 + $0xd0] sm:$0xff] }
  0x1b   :  { %v76_v33 = vld [vmem:[#allocation2 + $0xd8] sm:$0xff]  ;;  %v241_v34 = vpack.c.bf16 %v58_v31, %v57_v30  ;;  %v59_v36 = vld [vmem:[#allocation2 + $0x50] sm:$0xff]  ;;  %v77_v38 = vld [vmem:[#allocation2 + $0xe0] sm:$0xff]  ;;  %p308_p12 = pnand %p307_p11, %p301_p8 }
  0x1c   :  { %230 = vmatpush3.bf16.msra.mxu0 %v229_v16  ;;  %264 = vmatpush3.bf16.msra.mxu1 %v229_v16  ;;  %v243_v35 = vpack.c.bf16 %v76_v33, %v75_v32  ;;  %v60_v37 = vld [vmem:[#allocation2 + $0x58] sm:$0xff]  ;;  %v78_v39 = vld [vmem:[#allocation2 + $0xe8] sm:$0xff]  ;;  %v61_v42 = vld [vmem:[#allocation2 + $0x60] sm:$0xff] }
  0x1d   :  { %232 = vmatprep.subr.bf16.mxu0 %v231_v17  ;;  %257 = vmatprep.subr.bf16.mxu1 %v231_v17  ;;  %v245_v40 = vpack.c.bf16 %v60_v37, %v59_v36  ;;  %v247_v41 = vpack.c.bf16 %v78_v39, %v77_v38  ;;  %v62_v43 = vld [vmem:[#allocation2 + $0x68] sm:$0xff]  ;;  %v79_v44 = vld [vmem:[#allocation2 + $0xf0] sm:$0xff]  ;;  %v80_v45 = vld [vmem:[#allocation2 + $0xf8] sm:$0xff] }
  0x1e   :  { %v249_v46 = vpack.c.bf16 %v62_v43, %v61_v42  ;;  %v251_v47 = vpack.c.bf16 %v80_v45, %v79_v44  ;;  %v63_v48 = vld [vmem:[#allocation2 + $0x70] sm:$0xff]  ;;  %v64_v49 = vld [vmem:[#allocation2 + $0x78] sm:$0xff] }
  0x1f   :  { %v253_v50 = vpack.c.bf16 %v64_v49, %v63_v48 }
  0x20   :  { %234 = vmatpush3.bf16.msra.mxu0 %v233_v22  ;;  %265 = vmatpush3.bf16.msra.mxu1 %v233_v22 }
  0x21   :  { %236 = vmatprep.subr.bf16.mxu0 %v235_v23  ;;  %258 = vmatprep.subr.bf16.mxu1 %v235_v23 }
  0x24   :  { %238 = vmatpush3.bf16.msra.mxu0 %v237_v28  ;;  %266 = vmatpush3.bf16.msra.mxu1 %v237_v28 }
  0x25   :  { %240 = vmatprep.subr.bf16.mxu0 %v239_v29  ;;  %259 = vmatprep.subr.bf16.mxu1 %v239_v29 }
  0x28   :  { %242 = vmatpush3.bf16.msra.mxu0 %v241_v34  ;;  %267 = vmatpush3.bf16.msra.mxu1 %v241_v34 }
  0x29   :  { %244 = vmatprep.subr.bf16.mxu0 %v243_v35  ;;  %260 = vmatprep.subr.bf16.mxu1 %v243_v35 }
  0x2c   :  { %246 = vmatpush3.bf16.msra.mxu0 %v245_v40  ;;  %268 = vmatpush3.bf16.msra.mxu1 %v245_v40 }
  0x2d   :  { %248 = vmatprep.subr.bf16.mxu0 %v247_v41  ;;  %261 = vmatprep.subr.bf16.mxu1 %v247_v41 }
  0x30   :  { %250 = vmatpush3.bf16.msra.mxu0 %v249_v46  ;;  %269 = vmatpush3.bf16.msra.mxu1 %v249_v46 }
  0x31   :  { %252 = vmatprep.subr.bf16.mxu0 %v251_v47  ;;  %262 = vmatprep.subr.bf16.mxu1 %v251_v47 }
  0x34   :  { %254 = vmatpush3.bf16.msra.mxu0 %v253_v50  ;;  %270 = vmatpush3.bf16.msra.mxu1 %v253_v50 }
  0x94   :  { %v33_v54 = vpop.permute.xlu0 %32 }
  0x95   :  { %vm37_vm0 = vcmp.eq.s32.totalorder %v29_v52, %v33_v54  ;;  %vm38_vm1 = vcmp.eq.s32.totalorder %v30_v53, %v33_v54 }
  0x96   :  { %181 = vmatprep.mubr.msk.f32.mxu0 %vm38_vm1, %v330_v55 }
  0x97   :  { %182 = vmatmul.mubr.msk.f32.vlgmr.msra.gmra.mrb[0].mxu0 %vm37_vm0, %v330_v55 }
  0x98   :  { %v36_v56 = vpop.permute.xlu0 %35 }
  0x99   :  { %vm39_vm2 = vcmp.eq.s32.totalorder %v29_v52, %v36_v56  ;;  %vm40_vm3 = vcmp.eq.s32.totalorder %v30_v53, %v36_v56 }
  0x9a   :  { %183 = vmatprep.mubr.msk.f32.mxu1 %vm40_vm3, %v330_v55 }
  0x9b   :  { %184 = vmatmul.mubr.msk.f32.vlgmr.msra.gmra.mrb[0].mxu1 %vm39_vm2, %v330_v55 }
 0x16a   :  { %v217_v57 = vpop.f32.mrb[0].mxu0 }
 0x16b   :  { %v218_v58 = vpop.f32.mrb[1].mxu0 }
 0x16c   :  { %v219_v59 = vadd.f32 %v218_v58, %v217_v57 }
 0x16e   :  { %v156_v60 = vmul.f32 11.313708, %v219_v59  ;;  %v220_v61 = vpop.f32.mrb[0].mxu1 }
 0x16f   :  { %v221_v62 = vpop.f32.mrb[1].mxu1 }
 0x170   :  { %158 = vst [vmem:[#allocation5] sm:$0xff] %v156_v60  ;;  %v222_v63 = vadd.f32 %v221_v62, %v220_v61 }
 0x172   :  { %v157_v0 = vmul.f32 11.313708, %v222_v63 }
 0x174   :  { %159 = vst [vmem:[#allocation5 + $0x8] sm:$0xff] %v157_v0 }
 0x175   :  { %311 = shalt.err (!%p308_p12)
}
 0x176   :  { %s312_s30 = scalar_lea.hbm %s385_s2, 256 }
 0x177   :  { %p313_p13 = scmp.ne.s32.totalorder %s385_s2, %s312_s30  ;;  %p316_p0 = scmp.lt.u32.totalorder %s312_s30, %s385_s2 }
 0x179   :  { %p318_p1 = pnand %p316_p0, %p313_p13 }
 0x17b   :  { %321 = shalt.err (!%p318_p1)
}
 0x17c   :  { %171 = dma.vmem_to_hbm [thread:$0]  %s166_s1, 256, %s385_s2, [#allocation4], %s327_s19, %s327_s19, %s328_s20  }
 0x17d   :  { %324 = dma.done.wait [#allocation4], 256  }
 0x17e   :  { %325 = vsyncadd [#allocation4], 4294967040 }
 0x17f   :  { %175 = vsyncpa [#allocation3], 1 }
 0x180   :  { %176 = vsyncpa [#allocation4], 1 }

</bundles_post_ra>
